<compile_context>
chip_gen: v7x
topology: tpu7x:2x2x1
jax: 0.10.0
libtpu: 0.0.40
codegen_flags: <defaults>
</compile_context>

<pallas_src>
import math
import jax
import jax.numpy as jnp
from jax.experimental import pallas as pl
from jax.experimental.pallas import tpu as pltpu

# Small, module-consistent shapes (d_model divisible by n_heads).
D_MODEL = 32
N_HEADS = 4
D_K = D_MODEL // N_HEADS
D_FF = D_MODEL * 4
EPS = 1e-5  # nn.LayerNorm default eps

# --- Row layout of the packed 32-lane attention slab (shape (4*D_MODEL, D_MODEL)) ---
#   rows 24h+0..7   : Wq[:, h*dk:(h+1)*dk]^T      (dk, D)
#   rows 24h+8..15  : Wk[:, ...]^T
#   rows 24h+16..23 : Wv[:, ...]^T
#   rows 96+8h..    : Wo[h*dk:(h+1)*dk, :]        (dk, D)
R_WO = 3 * N_HEADS * D_K  # 96

# --- Row layout of the packed 128-lane "big" slab (FFN weights + every vector) ---
R_W1 = 0                       # (D, D_FF) = (32, 128)
R_W2T = R_W1 + D_MODEL         # w2^T, (D, D_FF) = (32, 128)
R_B1 = R_W2T + D_MODEL         # 64  (1, 128)
R_BO = R_B1 + 1                # 65  (1, 32)
R_G1 = R_BO + 1                # 66
R_BE1 = R_G1 + 1               # 67
R_G2 = R_BE1 + 1               # 68
R_BE2 = R_G2 + 1               # 69
R_B2 = R_BE2 + 1               # 70
R_BQ = R_B2 + 1                # 71..74  per-head q bias, lanes 0:8
R_BK = R_BQ + N_HEADS          # 75..78
R_BV = R_BK + N_HEADS          # 79..82
N_BIG_ROWS = R_BV + N_HEADS    # 83
BIG_ROWS_PAD = ((N_BIG_ROWS + 7) // 8) * 8  # 88


def _layernorm(x, gamma, beta):
    mu = jnp.mean(x, axis=-1, keepdims=True)
    var = jnp.mean((x - mu) ** 2, axis=-1, keepdims=True)
    return (x - mu) * jax.lax.rsqrt(var + EPS) * gamma + beta


def make_kernel(B, S):
    BS = B * S
    scale = 1.0 / math.sqrt(D_K)
    # Contract the LAST dims of both operands (q @ k^T / x @ W^T: transposed operand
    # fed MXU-side, no XLU transpose traffic).
    dn_t = (((1,), (1,)), ((), ()))
    assert S & (S - 1) == 0, "block-diag mask builder assumes power-of-two seq len"

    def kernel(x_ref, wa_ref, wb_ref, out_ref):
        x = x_ref[...]  # (BS, D) dense activation slab

        # Block-diagonal batch mask: one (BS, BS) score matmul per head serves every
        # sequence; cross-batch entries get -1e9 and underflow to exact 0 in softmax.
        # (i ^ j) < S  <=>  i and j in the same length-S block, for power-of-two S.
        ri = jax.lax.broadcasted_iota(jnp.int32, (BS, BS), 0)
        ci = jax.lax.broadcasted_iota(jnp.int32, (BS, BS), 1)
        mask = jnp.where((ri ^ ci) < S, jnp.float32(0.0), jnp.float32(-1e9))

        # Residual + output-projection bias up front; per-head contributions are
        # accumulated into a register value (no scratch, no masked lane-offset stores).
        acc = x + wb_ref[R_BO:R_BO + 1, :D_MODEL]

        for h in range(N_HEADS):  # static unroll, H = 4
            r0 = 3 * h * D_K
            wqT = wa_ref[r0:r0 + D_K, :]                               # (dk, D)
            wkT = wa_ref[r0 + D_K:r0 + 2 * D_K, :]
            wvT = wa_ref[r0 + 2 * D_K:r0 + 3 * D_K, :]
            woh = wa_ref[R_WO + h * D_K:R_WO + (h + 1) * D_K, :]       # (dk, D)

            bq = wb_ref[R_BQ + h:R_BQ + h + 1, :D_K]                   # (1, dk), lane 0
            bk = wb_ref[R_BK + h:R_BK + h + 1, :D_K]
            bv = wb_ref[R_BV + h:R_BV + h + 1, :D_K]

            q = jax.lax.dot_general(x, wqT, dn_t,
                                    preferred_element_type=jnp.float32) + bq  # (BS, dk)
            k = jax.lax.dot_general(x, wkT, dn_t,
                                    preferred_element_type=jnp.float32) + bk
            v = jax.lax.dot_general(x, wvT, dn_t,
                                    preferred_element_type=jnp.float32) + bv

            s = jax.lax.dot_general(q, k, dn_t,
                                    preferred_element_type=jnp.float32) * scale + mask
            s = s - jnp.max(s, axis=-1, keepdims=True)                 # stable softmax
            p = jnp.exp(s)
            p = p / jnp.sum(p, axis=-1, keepdims=True)                 # exact divide

            o = jnp.dot(p, v, preferred_element_type=jnp.float32)      # (BS, dk)
            # Fold the output projection into the head loop (no attn scratch).
            acc = acc + jnp.dot(o, woh, preferred_element_type=jnp.float32)

        y = _layernorm(acc,
                       wb_ref[R_G1:R_G1 + 1, :D_MODEL],
                       wb_ref[R_BE1:R_BE1 + 1, :D_MODEL])

        # Position-wise FFN ("Linear"): Linear -> ReLU -> Linear (+ residual, LN).
        h1 = jnp.maximum(
            jnp.dot(y, wb_ref[R_W1:R_W1 + D_MODEL, :],
                    preferred_element_type=jnp.float32)
            + wb_ref[R_B1:R_B1 + 1, :], 0.0)                           # (BS, D_FF)
        z = jax.lax.dot_general(h1, wb_ref[R_W2T:R_W2T + D_MODEL, :], dn_t,
                                preferred_element_type=jnp.float32) \
            + wb_ref[R_B2:R_B2 + 1, :D_MODEL]                          # (BS, D)
        out_ref[...] = _layernorm(y + z,
                                  wb_ref[R_G2:R_G2 + 1, :D_MODEL],
                                  wb_ref[R_BE2:R_BE2 + 1, :D_MODEL]).astype(out_ref.dtype)

    return kernel


def pack_params(p):
    """Pack all parameters into two dense slabs (2 DMAs instead of 13)."""
    wq, wk, wv, wo = p["wq"], p["wk"], p["wv"], p["wo"]

    blocks = []
    for h in range(N_HEADS):
        sl = slice(h * D_K, (h + 1) * D_K)
        blocks += [wq[:, sl].T, wk[:, sl].T, wv[:, sl].T]
    for h in range(N_HEADS):
        blocks.append(wo[h * D_K:(h + 1) * D_K, :])
    w_attn = jnp.concatenate(blocks, axis=0)                 # (128, 32)

    def row128(v):
        v = v.reshape(1, -1)
        return jnp.pad(v, ((0, 0), (0, D_FF - v.shape[1])))

    rows = [p["w1"], p["w2"].T, p["b1"].reshape(1, -1),
            row128(p["bo"]), row128(p["g1"]), row128(p["be1"]),
            row128(p["g2"]), row128(p["be2"]), row128(p["b2"])]
    rows += [row128(p["bq"][:, h * D_K:(h + 1) * D_K]) for h in range(N_HEADS)]
    rows += [row128(p["bk"][:, h * D_K:(h + 1) * D_K]) for h in range(N_HEADS)]
    rows += [row128(p["bv"][:, h * D_K:(h + 1) * D_K]) for h in range(N_HEADS)]
    w_big = jnp.concatenate(rows, axis=0)                    # (83, 128)
    w_big = jnp.pad(w_big, ((0, BIG_ROWS_PAD - w_big.shape[0]), (0, 0)))  # (88, 128)
    return w_attn, w_big


def encoder_layer(x, params):
    B, S, D = x.shape
    assert D == D_MODEL
    x2 = x.reshape(B * S, D)  # one lane/sublane-dense activation slab, one DMA
    w_attn, w_big = pack_params(params)

    out = pl.pallas_call(
        make_kernel(B, S),
        out_shape=jax.ShapeDtypeStruct((B * S, D), x.dtype),
        # Gridless single-shot call: whole arrays resident in VMEM, no pipelining
        # bookkeeping and no useless input double-buffering.
        in_specs=[pl.BlockSpec(memory_space=pltpu.MemorySpace.VMEM)] * 3,
        out_specs=pl.BlockSpec(memory_space=pltpu.MemorySpace.VMEM),
    )(x2, w_attn, w_big)
    return out.reshape(B, S, D)


def init_params(key):
    """Deterministic init mirroring PyTorch shapes (weights stored as (in, out))."""
    ks = jax.random.split(key, 8)

    def linear(k, fan_in, fan_out):
        bound = 1.0 / math.sqrt(fan_in)
        kw, kb = jax.random.split(k)
        w = jax.random.uniform(kw, (fan_in, fan_out), jnp.float32, -bound, bound)
        b = jax.random.uniform(kb, (1, fan_out), jnp.float32, -bound, bound)
        return w, b

    wq, bq = linear(ks[0], D_MODEL, D_MODEL)
    wk, bk = linear(ks[1], D_MODEL, D_MODEL)
    wv, bv = linear(ks[2], D_MODEL, D_MODEL)
    wo, bo = linear(ks[3], D_MODEL, D_MODEL)
    w1, b1 = linear(ks[4], D_MODEL, D_FF)
    w2, b2 = linear(ks[5], D_FF, D_MODEL)
    ones = jnp.ones((1, D_MODEL), jnp.float32)
    zeros = jnp.zeros((1, D_MODEL), jnp.float32)
    return dict(wq=wq, bq=bq, wk=wk, bk=bk, wv=wv, bv=bv, wo=wo, bo=bo,
                g1=ones, be1=zeros, w1=w1, b1=b1, w2=w2, b2=b2,
                g2=ones, be2=zeros)


def encoder_layer_ref(x, p):
    """Pure-JAX reference mirroring the PyTorch forward (eval mode)."""
    B, S, D = x.shape
    q = x @ p["wq"] + p["bq"]
    k = x @ p["wk"] + p["bk"]
    v = x @ p["wv"] + p["bv"]

    def split(t):  # (B,S,D) -> (B,H,S,dk)
        return t.reshape(B, S, N_HEADS, D_K).transpose(0, 2, 1, 3)

    q, k, v = split(q), split(k), split(v)
    s = jnp.einsum("bhqd,bhkd->bhqk", q, k) / math.sqrt(D_K)
    w = jax.nn.softmax(s, axis=-1)
    a = jnp.einsum("bhqk,bhkd->bhqd", w, v).transpose(0, 2, 1, 3).reshape(B, S, D)
    y = _layernorm(x + a @ p["wo"] + p["bo"], p["g1"], p["be1"])
    h1 = jax.nn.relu(y @ p["w1"] + p["b1"])
    z = h1 @ p["w2"] + p["b2"]
    return _layernorm(y + z, p["g2"], p["be2"])


if __name__ == "__main__":
    key = jax.random.PRNGKey(0)
    kx, kp = jax.random.split(key)
    B, S = 2, 8
    x = jax.random.normal(kx, (B, S, D_MODEL), jnp.float32)
    params = init_params(kp)

    out = encoder_layer(x, params)
    out = jax.block_until_ready(out)

    # Force full-f32 matmul passes in the XLA reference so the comparison is not
    # polluted by the backend's default reduced-precision f32 dot path.
    with jax.default_matmul_precision("float32"):
        ref = encoder_layer_ref(x, params)
    ref = jax.block_until_ready(ref)

    assert out.shape == (B, S, D_MODEL)
    # Exact softmax division restored (review item): the kernel has no approximate math.
    # Remaining allowance only covers XLA-vs-Mosaic f32 MXU multi-pass rounding differences.
    assert jnp.allclose(out, ref, atol=5e-3, rtol=5e-3)
    print("KERNEL_OK")
</pallas_src>

<mosaic_0001>
module attributes {stable_mosaic.version = 11 : i64} {
  func.func @kernel(%arg0: memref<16x32xf32, #tpu.memory_space<vmem>>, %arg1: memref<128x32xf32, #tpu.memory_space<vmem>>, %arg2: memref<88x128xf32, #tpu.memory_space<vmem>>, %arg3: memref<16x32xf32, #tpu.memory_space<vmem>>) attributes {dimension_semantics = [], scalar_prefetch = 0 : i64, scratch_operands = 0 : i64, tpu.core_type = #tpu.core_type<tc>} {
    %c0 = arith.constant 0 : index
    %c0_0 = arith.constant 0 : index
    %0 = vector.load %arg0[%c0, %c0_0] : memref<16x32xf32, #tpu.memory_space<vmem>>, vector<16x32xf32>
    %1 = tpu.iota {dimensions = array<i32: 0>} : vector<16x16xi32>
    %2 = tpu.iota {dimensions = array<i32: 1>} : vector<16x16xi32>
    %3 = arith.xori %1, %2 : vector<16x16xi32>
    %c8_i32 = arith.constant 8 : i32
    %4 = vector.broadcast %c8_i32 : i32 to vector<16x16xi32>
    %5 = arith.cmpi slt, %3, %4 : vector<16x16xi32>
    %cst = arith.constant 0.000000e+00 : f32
    %cst_1 = arith.constant -1.000000e+09 : f32
    %6 = vector.broadcast %cst : f32 to vector<16x16xf32>
    %7 = vector.broadcast %cst_1 : f32 to vector<16x16xf32>
    %8 = arith.select %5, %6, %7 : vector<16x16xi1>, vector<16x16xf32>
    %c65 = arith.constant 65 : index
    %c0_2 = arith.constant 0 : index
    %9 = vector.load %arg2[%c65, %c0_2] : memref<88x128xf32, #tpu.memory_space<vmem>>, vector<1x32xf32>
    %10 = vector.broadcast %9 : vector<1x32xf32> to vector<16x32xf32>
    %11 = arith.addf %0, %10 : vector<16x32xf32>
    %c0_3 = arith.constant 0 : index
    %c0_4 = arith.constant 0 : index
    %12 = vector.load %arg1[%c0_3, %c0_4] : memref<128x32xf32, #tpu.memory_space<vmem>>, vector<8x32xf32>
    %c8 = arith.constant 8 : index
    %c0_5 = arith.constant 0 : index
    %13 = vector.load %arg1[%c8, %c0_5] : memref<128x32xf32, #tpu.memory_space<vmem>>, vector<8x32xf32>
    %c16 = arith.constant 16 : index
    %c0_6 = arith.constant 0 : index
    %14 = vector.load %arg1[%c16, %c0_6] : memref<128x32xf32, #tpu.memory_space<vmem>>, vector<8x32xf32>
    %c96 = arith.constant 96 : index
    %c0_7 = arith.constant 0 : index
    %15 = vector.load %arg1[%c96, %c0_7] : memref<128x32xf32, #tpu.memory_space<vmem>>, vector<8x32xf32>
    %c71 = arith.constant 71 : index
    %c0_8 = arith.constant 0 : index
    %16 = vector.load %arg2[%c71, %c0_8] : memref<88x128xf32, #tpu.memory_space<vmem>>, vector<1x8xf32>
    %c75 = arith.constant 75 : index
    %c0_9 = arith.constant 0 : index
    %17 = vector.load %arg2[%c75, %c0_9] : memref<88x128xf32, #tpu.memory_space<vmem>>, vector<1x8xf32>
    %c79 = arith.constant 79 : index
    %c0_10 = arith.constant 0 : index
    %18 = vector.load %arg2[%c79, %c0_10] : memref<88x128xf32, #tpu.memory_space<vmem>>, vector<1x8xf32>
    %cst_11 = arith.constant dense<0.000000e+00> : vector<16x8xf32>
    %19 = tpu.matmul %0, %12, %cst_11 {dimension_numbers = #tpu.dot_dimension_numbers<[1], [1], [0], [0], [0, 0, 1, 0], [], []>} : vector<16x32xf32>, vector<8x32xf32>, vector<16x8xf32> -> vector<16x8xf32>
    %20 = vector.broadcast %16 : vector<1x8xf32> to vector<16x8xf32>
    %21 = arith.addf %19, %20 : vector<16x8xf32>
    %cst_12 = arith.constant dense<0.000000e+00> : vector<16x8xf32>
    %22 = tpu.matmul %0, %13, %cst_12 {dimension_numbers = #tpu.dot_dimension_numbers<[1], [1], [0], [0], [0, 0, 1, 0], [], []>} : vector<16x32xf32>, vector<8x32xf32>, vector<16x8xf32> -> vector<16x8xf32>
    %23 = vector.broadcast %17 : vector<1x8xf32> to vector<16x8xf32>
    %24 = arith.addf %22, %23 : vector<16x8xf32>
    %cst_13 = arith.constant dense<0.000000e+00> : vector<16x8xf32>
    %25 = tpu.matmul %0, %14, %cst_13 {dimension_numbers = #tpu.dot_dimension_numbers<[1], [1], [0], [0], [0, 0, 1, 0], [], []>} : vector<16x32xf32>, vector<8x32xf32>, vector<16x8xf32> -> vector<16x8xf32>
    %26 = vector.broadcast %18 : vector<1x8xf32> to vector<16x8xf32>
    %27 = arith.addf %25, %26 : vector<16x8xf32>
    %cst_14 = arith.constant dense<0.000000e+00> : vector<16x16xf32>
    %28 = tpu.matmul %21, %24, %cst_14 {dimension_numbers = #tpu.dot_dimension_numbers<[1], [1], [0], [0], [0, 0, 1, 0], [], []>} : vector<16x8xf32>, vector<16x8xf32>, vector<16x16xf32> -> vector<16x16xf32>
    %cst_15 = arith.constant 0.353553385 : f32
    %29 = vector.broadcast %cst_15 : f32 to vector<16x16xf32>
    %30 = arith.mulf %28, %29 : vector<16x16xf32>
    %31 = arith.addf %30, %8 : vector<16x16xf32>
    %cst_16 = arith.constant dense<0xFF800000> : vector<16xf32>
    %32 = vector.multi_reduction <maximumf>, %31, %cst_16 [1] : vector<16x16xf32> to vector<16xf32>
    %33 = vector.shape_cast %32 : vector<16xf32> to vector<16x1xf32>
    %34 = vector.broadcast %33 : vector<16x1xf32> to vector<16x16xf32>
    %35 = arith.subf %31, %34 : vector<16x16xf32>
    %36 = math.exp %35 : vector<16x16xf32>
    %cst_17 = arith.constant dense<0.000000e+00> : vector<16xf32>
    %37 = vector.multi_reduction <add>, %36, %cst_17 [1] : vector<16x16xf32> to vector<16xf32>
    %38 = vector.shape_cast %37 : vector<16xf32> to vector<16x1xf32>
    %39 = vector.broadcast %38 : vector<16x1xf32> to vector<16x16xf32>
    %40 = arith.divf %36, %39 : vector<16x16xf32>
    %cst_18 = arith.constant dense<0.000000e+00> : vector<16x8xf32>
    %41 = tpu.matmul %40, %27, %cst_18 {dimension_numbers = #tpu.dot_dimension_numbers<[1], [0], [0], [1], [0, 0, 1, 1], [], []>} : vector<16x16xf32>, vector<16x8xf32>, vector<16x8xf32> -> vector<16x8xf32>
    %cst_19 = arith.constant dense<0.000000e+00> : vector<16x32xf32>
    %42 = tpu.matmul %41, %15, %cst_19 {dimension_numbers = #tpu.dot_dimension_numbers<[1], [0], [0], [1], [0, 0, 1, 1], [], []>} : vector<16x8xf32>, vector<8x32xf32>, vector<16x32xf32> -> vector<16x32xf32>
    %43 = arith.addf %11, %42 : vector<16x32xf32>
    %c24 = arith.constant 24 : index
    %c0_20 = arith.constant 0 : index
    %44 = vector.load %arg1[%c24, %c0_20] : memref<128x32xf32, #tpu.memory_space<vmem>>, vector<8x32xf32>
    %c32 = arith.constant 32 : index
    %c0_21 = arith.constant 0 : index
    %45 = vector.load %arg1[%c32, %c0_21] : memref<128x32xf32, #tpu.memory_space<vmem>>, vector<8x32xf32>
    %c40 = arith.constant 40 : index
    %c0_22 = arith.constant 0 : index
    %46 = vector.load %arg1[%c40, %c0_22] : memref<128x32xf32, #tpu.memory_space<vmem>>, vector<8x32xf32>
    %c104 = arith.constant 104 : index
    %c0_23 = arith.constant 0 : index
    %47 = vector.load %arg1[%c104, %c0_23] : memref<128x32xf32, #tpu.memory_space<vmem>>, vector<8x32xf32>
    %c72 = arith.constant 72 : index
    %c0_24 = arith.constant 0 : index
    %48 = vector.load %arg2[%c72, %c0_24] : memref<88x128xf32, #tpu.memory_space<vmem>>, vector<1x8xf32>
    %c76 = arith.constant 76 : index
    %c0_25 = arith.constant 0 : index
    %49 = vector.load %arg2[%c76, %c0_25] : memref<88x128xf32, #tpu.memory_space<vmem>>, vector<1x8xf32>
    %c80 = arith.constant 80 : index
    %c0_26 = arith.constant 0 : index
    %50 = vector.load %arg2[%c80, %c0_26] : memref<88x128xf32, #tpu.memory_space<vmem>>, vector<1x8xf32>
    %cst_27 = arith.constant dense<0.000000e+00> : vector<16x8xf32>
    %51 = tpu.matmul %0, %44, %cst_27 {dimension_numbers = #tpu.dot_dimension_numbers<[1], [1], [0], [0], [0, 0, 1, 0], [], []>} : vector<16x32xf32>, vector<8x32xf32>, vector<16x8xf32> -> vector<16x8xf32>
    %52 = vector.broadcast %48 : vector<1x8xf32> to vector<16x8xf32>
    %53 = arith.addf %51, %52 : vector<16x8xf32>
    %cst_28 = arith.constant dense<0.000000e+00> : vector<16x8xf32>
    %54 = tpu.matmul %0, %45, %cst_28 {dimension_numbers = #tpu.dot_dimension_numbers<[1], [1], [0], [0], [0, 0, 1, 0], [], []>} : vector<16x32xf32>, vector<8x32xf32>, vector<16x8xf32> -> vector<16x8xf32>
    %55 = vector.broadcast %49 : vector<1x8xf32> to vector<16x8xf32>
    %56 = arith.addf %54, %55 : vector<16x8xf32>
    %cst_29 = arith.constant dense<0.000000e+00> : vector<16x8xf32>
    %57 = tpu.matmul %0, %46, %cst_29 {dimension_numbers = #tpu.dot_dimension_numbers<[1], [1], [0], [0], [0, 0, 1, 0], [], []>} : vector<16x32xf32>, vector<8x32xf32>, vector<16x8xf32> -> vector<16x8xf32>
    %58 = vector.broadcast %50 : vector<1x8xf32> to vector<16x8xf32>
    %59 = arith.addf %57, %58 : vector<16x8xf32>
    %cst_30 = arith.constant dense<0.000000e+00> : vector<16x16xf32>
    %60 = tpu.matmul %53, %56, %cst_30 {dimension_numbers = #tpu.dot_dimension_numbers<[1], [1], [0], [0], [0, 0, 1, 0], [], []>} : vector<16x8xf32>, vector<16x8xf32>, vector<16x16xf32> -> vector<16x16xf32>
    %cst_31 = arith.constant 0.353553385 : f32
    %61 = vector.broadcast %cst_31 : f32 to vector<16x16xf32>
    %62 = arith.mulf %60, %61 : vector<16x16xf32>
    %63 = arith.addf %62, %8 : vector<16x16xf32>
    %cst_32 = arith.constant dense<0xFF800000> : vector<16xf32>
    %64 = vector.multi_reduction <maximumf>, %63, %cst_32 [1] : vector<16x16xf32> to vector<16xf32>
    %65 = vector.shape_cast %64 : vector<16xf32> to vector<16x1xf32>
    %66 = vector.broadcast %65 : vector<16x1xf32> to vector<16x16xf32>
    %67 = arith.subf %63, %66 : vector<16x16xf32>
    %68 = math.exp %67 : vector<16x16xf32>
    %cst_33 = arith.constant dense<0.000000e+00> : vector<16xf32>
    %69 = vector.multi_reduction <add>, %68, %cst_33 [1] : vector<16x16xf32> to vector<16xf32>
    %70 = vector.shape_cast %69 : vector<16xf32> to vector<16x1xf32>
    %71 = vector.broadcast %70 : vector<16x1xf32> to vector<16x16xf32>
    %72 = arith.divf %68, %71 : vector<16x16xf32>
    %cst_34 = arith.constant dense<0.000000e+00> : vector<16x8xf32>
    %73 = tpu.matmul %72, %59, %cst_34 {dimension_numbers = #tpu.dot_dimension_numbers<[1], [0], [0], [1], [0, 0, 1, 1], [], []>} : vector<16x16xf32>, vector<16x8xf32>, vector<16x8xf32> -> vector<16x8xf32>
    %cst_35 = arith.constant dense<0.000000e+00> : vector<16x32xf32>
    %74 = tpu.matmul %73, %47, %cst_35 {dimension_numbers = #tpu.dot_dimension_numbers<[1], [0], [0], [1], [0, 0, 1, 1], [], []>} : vector<16x8xf32>, vector<8x32xf32>, vector<16x32xf32> -> vector<16x32xf32>
    %75 = arith.addf %43, %74 : vector<16x32xf32>
    %c48 = arith.constant 48 : index
    %c0_36 = arith.constant 0 : index
    %76 = vector.load %arg1[%c48, %c0_36] : memref<128x32xf32, #tpu.memory_space<vmem>>, vector<8x32xf32>
    %c56 = arith.constant 56 : index
    %c0_37 = arith.constant 0 : index
    %77 = vector.load %arg1[%c56, %c0_37] : memref<128x32xf32, #tpu.memory_space<vmem>>, vector<8x32xf32>
    %c64 = arith.constant 64 : index
    %c0_38 = arith.constant 0 : index
    %78 = vector.load %arg1[%c64, %c0_38] : memref<128x32xf32, #tpu.memory_space<vmem>>, vector<8x32xf32>
    %c112 = arith.constant 112 : index
    %c0_39 = arith.constant 0 : index
    %79 = vector.load %arg1[%c112, %c0_39] : memref<128x32xf32, #tpu.memory_space<vmem>>, vector<8x32xf32>
    %c73 = arith.constant 73 : index
    %c0_40 = arith.constant 0 : index
    %80 = vector.load %arg2[%c73, %c0_40] : memref<88x128xf32, #tpu.memory_space<vmem>>, vector<1x8xf32>
    %c77 = arith.constant 77 : index
    %c0_41 = arith.constant 0 : index
    %81 = vector.load %arg2[%c77, %c0_41] : memref<88x128xf32, #tpu.memory_space<vmem>>, vector<1x8xf32>
    %c81 = arith.constant 81 : index
    %c0_42 = arith.constant 0 : index
    %82 = vector.load %arg2[%c81, %c0_42] : memref<88x128xf32, #tpu.memory_space<vmem>>, vector<1x8xf32>
    %cst_43 = arith.constant dense<0.000000e+00> : vector<16x8xf32>
    %83 = tpu.matmul %0, %76, %cst_43 {dimension_numbers = #tpu.dot_dimension_numbers<[1], [1], [0], [0], [0, 0, 1, 0], [], []>} : vector<16x32xf32>, vector<8x32xf32>, vector<16x8xf32> -> vector<16x8xf32>
    %84 = vector.broadcast %80 : vector<1x8xf32> to vector<16x8xf32>
    %85 = arith.addf %83, %84 : vector<16x8xf32>
    %cst_44 = arith.constant dense<0.000000e+00> : vector<16x8xf32>
    %86 = tpu.matmul %0, %77, %cst_44 {dimension_numbers = #tpu.dot_dimension_numbers<[1], [1], [0], [0], [0, 0, 1, 0], [], []>} : vector<16x32xf32>, vector<8x32xf32>, vector<16x8xf32> -> vector<16x8xf32>
    %87 = vector.broadcast %81 : vector<1x8xf32> to vector<16x8xf32>
    %88 = arith.addf %86, %87 : vector<16x8xf32>
    %cst_45 = arith.constant dense<0.000000e+00> : vector<16x8xf32>
    %89 = tpu.matmul %0, %78, %cst_45 {dimension_numbers = #tpu.dot_dimension_numbers<[1], [1], [0], [0], [0, 0, 1, 0], [], []>} : vector<16x32xf32>, vector<8x32xf32>, vector<16x8xf32> -> vector<16x8xf32>
    %90 = vector.broadcast %82 : vector<1x8xf32> to vector<16x8xf32>
    %91 = arith.addf %89, %90 : vector<16x8xf32>
    %cst_46 = arith.constant dense<0.000000e+00> : vector<16x16xf32>
    %92 = tpu.matmul %85, %88, %cst_46 {dimension_numbers = #tpu.dot_dimension_numbers<[1], [1], [0], [0], [0, 0, 1, 0], [], []>} : vector<16x8xf32>, vector<16x8xf32>, vector<16x16xf32> -> vector<16x16xf32>
    %cst_47 = arith.constant 0.353553385 : f32
    %93 = vector.broadcast %cst_47 : f32 to vector<16x16xf32>
    %94 = arith.mulf %92, %93 : vector<16x16xf32>
    %95 = arith.addf %94, %8 : vector<16x16xf32>
    %cst_48 = arith.constant dense<0xFF800000> : vector<16xf32>
    %96 = vector.multi_reduction <maximumf>, %95, %cst_48 [1] : vector<16x16xf32> to vector<16xf32>
    %97 = vector.shape_cast %96 : vector<16xf32> to vector<16x1xf32>
    %98 = vector.broadcast %97 : vector<16x1xf32> to vector<16x16xf32>
    %99 = arith.subf %95, %98 : vector<16x16xf32>
    %100 = math.exp %99 : vector<16x16xf32>
    %cst_49 = arith.constant dense<0.000000e+00> : vector<16xf32>
    %101 = vector.multi_reduction <add>, %100, %cst_49 [1] : vector<16x16xf32> to vector<16xf32>
    %102 = vector.shape_cast %101 : vector<16xf32> to vector<16x1xf32>
    %103 = vector.broadcast %102 : vector<16x1xf32> to vector<16x16xf32>
    %104 = arith.divf %100, %103 : vector<16x16xf32>
    %cst_50 = arith.constant dense<0.000000e+00> : vector<16x8xf32>
    %105 = tpu.matmul %104, %91, %cst_50 {dimension_numbers = #tpu.dot_dimension_numbers<[1], [0], [0], [1], [0, 0, 1, 1], [], []>} : vector<16x16xf32>, vector<16x8xf32>, vector<16x8xf32> -> vector<16x8xf32>
    %cst_51 = arith.constant dense<0.000000e+00> : vector<16x32xf32>
    %106 = tpu.matmul %105, %79, %cst_51 {dimension_numbers = #tpu.dot_dimension_numbers<[1], [0], [0], [1], [0, 0, 1, 1], [], []>} : vector<16x8xf32>, vector<8x32xf32>, vector<16x32xf32> -> vector<16x32xf32>
    %107 = arith.addf %75, %106 : vector<16x32xf32>
    %c72_52 = arith.constant 72 : index
    %c0_53 = arith.constant 0 : index
    %108 = vector.load %arg1[%c72_52, %c0_53] : memref<128x32xf32, #tpu.memory_space<vmem>>, vector<8x32xf32>
    %c80_54 = arith.constant 80 : index
    %c0_55 = arith.constant 0 : index
    %109 = vector.load %arg1[%c80_54, %c0_55] : memref<128x32xf32, #tpu.memory_space<vmem>>, vector<8x32xf32>
    %c88 = arith.constant 88 : index
    %c0_56 = arith.constant 0 : index
    %110 = vector.load %arg1[%c88, %c0_56] : memref<128x32xf32, #tpu.memory_space<vmem>>, vector<8x32xf32>
    %c120 = arith.constant 120 : index
    %c0_57 = arith.constant 0 : index
    %111 = vector.load %arg1[%c120, %c0_57] : memref<128x32xf32, #tpu.memory_space<vmem>>, vector<8x32xf32>
    %c74 = arith.constant 74 : index
    %c0_58 = arith.constant 0 : index
    %112 = vector.load %arg2[%c74, %c0_58] : memref<88x128xf32, #tpu.memory_space<vmem>>, vector<1x8xf32>
    %c78 = arith.constant 78 : index
    %c0_59 = arith.constant 0 : index
    %113 = vector.load %arg2[%c78, %c0_59] : memref<88x128xf32, #tpu.memory_space<vmem>>, vector<1x8xf32>
    %c82 = arith.constant 82 : index
    %c0_60 = arith.constant 0 : index
    %114 = vector.load %arg2[%c82, %c0_60] : memref<88x128xf32, #tpu.memory_space<vmem>>, vector<1x8xf32>
    %cst_61 = arith.constant dense<0.000000e+00> : vector<16x8xf32>
    %115 = tpu.matmul %0, %108, %cst_61 {dimension_numbers = #tpu.dot_dimension_numbers<[1], [1], [0], [0], [0, 0, 1, 0], [], []>} : vector<16x32xf32>, vector<8x32xf32>, vector<16x8xf32> -> vector<16x8xf32>
    %116 = vector.broadcast %112 : vector<1x8xf32> to vector<16x8xf32>
    %117 = arith.addf %115, %116 : vector<16x8xf32>
    %cst_62 = arith.constant dense<0.000000e+00> : vector<16x8xf32>
    %118 = tpu.matmul %0, %109, %cst_62 {dimension_numbers = #tpu.dot_dimension_numbers<[1], [1], [0], [0], [0, 0, 1, 0], [], []>} : vector<16x32xf32>, vector<8x32xf32>, vector<16x8xf32> -> vector<16x8xf32>
    %119 = vector.broadcast %113 : vector<1x8xf32> to vector<16x8xf32>
    %120 = arith.addf %118, %119 : vector<16x8xf32>
    %cst_63 = arith.constant dense<0.000000e+00> : vector<16x8xf32>
    %121 = tpu.matmul %0, %110, %cst_63 {dimension_numbers = #tpu.dot_dimension_numbers<[1], [1], [0], [0], [0, 0, 1, 0], [], []>} : vector<16x32xf32>, vector<8x32xf32>, vector<16x8xf32> -> vector<16x8xf32>
    %122 = vector.broadcast %114 : vector<1x8xf32> to vector<16x8xf32>
    %123 = arith.addf %121, %122 : vector<16x8xf32>
    %cst_64 = arith.constant dense<0.000000e+00> : vector<16x16xf32>
    %124 = tpu.matmul %117, %120, %cst_64 {dimension_numbers = #tpu.dot_dimension_numbers<[1], [1], [0], [0], [0, 0, 1, 0], [], []>} : vector<16x8xf32>, vector<16x8xf32>, vector<16x16xf32> -> vector<16x16xf32>
    %cst_65 = arith.constant 0.353553385 : f32
    %125 = vector.broadcast %cst_65 : f32 to vector<16x16xf32>
    %126 = arith.mulf %124, %125 : vector<16x16xf32>
    %127 = arith.addf %126, %8 : vector<16x16xf32>
    %cst_66 = arith.constant dense<0xFF800000> : vector<16xf32>
    %128 = vector.multi_reduction <maximumf>, %127, %cst_66 [1] : vector<16x16xf32> to vector<16xf32>
    %129 = vector.shape_cast %128 : vector<16xf32> to vector<16x1xf32>
    %130 = vector.broadcast %129 : vector<16x1xf32> to vector<16x16xf32>
    %131 = arith.subf %127, %130 : vector<16x16xf32>
    %132 = math.exp %131 : vector<16x16xf32>
    %cst_67 = arith.constant dense<0.000000e+00> : vector<16xf32>
    %133 = vector.multi_reduction <add>, %132, %cst_67 [1] : vector<16x16xf32> to vector<16xf32>
    %134 = vector.shape_cast %133 : vector<16xf32> to vector<16x1xf32>
    %135 = vector.broadcast %134 : vector<16x1xf32> to vector<16x16xf32>
    %136 = arith.divf %132, %135 : vector<16x16xf32>
    %cst_68 = arith.constant dense<0.000000e+00> : vector<16x8xf32>
    %137 = tpu.matmul %136, %123, %cst_68 {dimension_numbers = #tpu.dot_dimension_numbers<[1], [0], [0], [1], [0, 0, 1, 1], [], []>} : vector<16x16xf32>, vector<16x8xf32>, vector<16x8xf32> -> vector<16x8xf32>
    %cst_69 = arith.constant dense<0.000000e+00> : vector<16x32xf32>
    %138 = tpu.matmul %137, %111, %cst_69 {dimension_numbers = #tpu.dot_dimension_numbers<[1], [0], [0], [1], [0, 0, 1, 1], [], []>} : vector<16x8xf32>, vector<8x32xf32>, vector<16x32xf32> -> vector<16x32xf32>
    %139 = arith.addf %107, %138 : vector<16x32xf32>
    %c66 = arith.constant 66 : index
    %c0_70 = arith.constant 0 : index
    %140 = vector.load %arg2[%c66, %c0_70] : memref<88x128xf32, #tpu.memory_space<vmem>>, vector<1x32xf32>
    %c67 = arith.constant 67 : index
    %c0_71 = arith.constant 0 : index
    %141 = vector.load %arg2[%c67, %c0_71] : memref<88x128xf32, #tpu.memory_space<vmem>>, vector<1x32xf32>
    %cst_72 = arith.constant dense<0.000000e+00> : vector<16xf32>
    %142 = vector.multi_reduction <add>, %139, %cst_72 [1] : vector<16x32xf32> to vector<16xf32>
    %143 = vector.shape_cast %142 : vector<16xf32> to vector<16x1xf32>
    %cst_73 = arith.constant 3.200000e+01 : f32
    %144 = vector.broadcast %cst_73 : f32 to vector<16x1xf32>
    %145 = arith.divf %143, %144 : vector<16x1xf32>
    %146 = vector.broadcast %145 : vector<16x1xf32> to vector<16x32xf32>
    %147 = arith.subf %139, %146 : vector<16x32xf32>
    %148 = arith.mulf %147, %147 : vector<16x32xf32>
    %cst_74 = arith.constant dense<0.000000e+00> : vector<16xf32>
    %149 = vector.multi_reduction <add>, %148, %cst_74 [1] : vector<16x32xf32> to vector<16xf32>
    %150 = vector.shape_cast %149 : vector<16xf32> to vector<16x1xf32>
    %cst_75 = arith.constant 3.200000e+01 : f32
    %151 = vector.broadcast %cst_75 : f32 to vector<16x1xf32>
    %152 = arith.divf %150, %151 : vector<16x1xf32>
    %153 = vector.broadcast %145 : vector<16x1xf32> to vector<16x32xf32>
    %154 = arith.subf %139, %153 : vector<16x32xf32>
    %cst_76 = arith.constant 9.99999974E-6 : f32
    %155 = vector.broadcast %cst_76 : f32 to vector<16x1xf32>
    %156 = arith.addf %152, %155 : vector<16x1xf32>
    %157 = math.rsqrt %156 : vector<16x1xf32>
    %158 = vector.broadcast %157 : vector<16x1xf32> to vector<16x32xf32>
    %159 = arith.mulf %154, %158 : vector<16x32xf32>
    %160 = vector.broadcast %140 : vector<1x32xf32> to vector<16x32xf32>
    %161 = arith.mulf %159, %160 : vector<16x32xf32>
    %162 = vector.broadcast %141 : vector<1x32xf32> to vector<16x32xf32>
    %163 = arith.addf %161, %162 : vector<16x32xf32>
    %c0_77 = arith.constant 0 : index
    %c0_78 = arith.constant 0 : index
    %164 = vector.load %arg2[%c0_77, %c0_78] : memref<88x128xf32, #tpu.memory_space<vmem>>, vector<32x128xf32>
    %cst_79 = arith.constant dense<0.000000e+00> : vector<16x128xf32>
    %165 = tpu.matmul %163, %164, %cst_79 {dimension_numbers = #tpu.dot_dimension_numbers<[1], [0], [0], [1], [0, 0, 1, 1], [], []>} : vector<16x32xf32>, vector<32x128xf32>, vector<16x128xf32> -> vector<16x128xf32>
    %c64_80 = arith.constant 64 : index
    %c0_81 = arith.constant 0 : index
    %166 = vector.load %arg2[%c64_80, %c0_81] : memref<88x128xf32, #tpu.memory_space<vmem>>, vector<1x128xf32>
    %167 = vector.broadcast %166 : vector<1x128xf32> to vector<16x128xf32>
    %168 = arith.addf %165, %167 : vector<16x128xf32>
    %cst_82 = arith.constant 0.000000e+00 : f32
    %169 = vector.broadcast %cst_82 : f32 to vector<16x128xf32>
    %170 = arith.maximumf %168, %169 : vector<16x128xf32>
    %c32_83 = arith.constant 32 : index
    %c0_84 = arith.constant 0 : index
    %171 = vector.load %arg2[%c32_83, %c0_84] : memref<88x128xf32, #tpu.memory_space<vmem>>, vector<32x128xf32>
    %cst_85 = arith.constant dense<0.000000e+00> : vector<16x32xf32>
    %172 = tpu.matmul %170, %171, %cst_85 {dimension_numbers = #tpu.dot_dimension_numbers<[1], [1], [0], [0], [0, 0, 1, 0], [], []>} : vector<16x128xf32>, vector<32x128xf32>, vector<16x32xf32> -> vector<16x32xf32>
    %c70 = arith.constant 70 : index
    %c0_86 = arith.constant 0 : index
    %173 = vector.load %arg2[%c70, %c0_86] : memref<88x128xf32, #tpu.memory_space<vmem>>, vector<1x32xf32>
    %174 = vector.broadcast %173 : vector<1x32xf32> to vector<16x32xf32>
    %175 = arith.addf %172, %174 : vector<16x32xf32>
    %176 = arith.addf %163, %175 : vector<16x32xf32>
    %c68 = arith.constant 68 : index
    %c0_87 = arith.constant 0 : index
    %177 = vector.load %arg2[%c68, %c0_87] : memref<88x128xf32, #tpu.memory_space<vmem>>, vector<1x32xf32>
    %c69 = arith.constant 69 : index
    %c0_88 = arith.constant 0 : index
    %178 = vector.load %arg2[%c69, %c0_88] : memref<88x128xf32, #tpu.memory_space<vmem>>, vector<1x32xf32>
    %cst_89 = arith.constant dense<0.000000e+00> : vector<16xf32>
    %179 = vector.multi_reduction <add>, %176, %cst_89 [1] : vector<16x32xf32> to vector<16xf32>
    %180 = vector.shape_cast %179 : vector<16xf32> to vector<16x1xf32>
    %cst_90 = arith.constant 3.200000e+01 : f32
    %181 = vector.broadcast %cst_90 : f32 to vector<16x1xf32>
    %182 = arith.divf %180, %181 : vector<16x1xf32>
    %183 = vector.broadcast %182 : vector<16x1xf32> to vector<16x32xf32>
    %184 = arith.subf %176, %183 : vector<16x32xf32>
    %185 = arith.mulf %184, %184 : vector<16x32xf32>
    %cst_91 = arith.constant dense<0.000000e+00> : vector<16xf32>
    %186 = vector.multi_reduction <add>, %185, %cst_91 [1] : vector<16x32xf32> to vector<16xf32>
    %187 = vector.shape_cast %186 : vector<16xf32> to vector<16x1xf32>
    %cst_92 = arith.constant 3.200000e+01 : f32
    %188 = vector.broadcast %cst_92 : f32 to vector<16x1xf32>
    %189 = arith.divf %187, %188 : vector<16x1xf32>
    %190 = vector.broadcast %182 : vector<16x1xf32> to vector<16x32xf32>
    %191 = arith.subf %176, %190 : vector<16x32xf32>
    %cst_93 = arith.constant 9.99999974E-6 : f32
    %192 = vector.broadcast %cst_93 : f32 to vector<16x1xf32>
    %193 = arith.addf %189, %192 : vector<16x1xf32>
    %194 = math.rsqrt %193 : vector<16x1xf32>
    %195 = vector.broadcast %194 : vector<16x1xf32> to vector<16x32xf32>
    %196 = arith.mulf %191, %195 : vector<16x32xf32>
    %197 = vector.broadcast %177 : vector<1x32xf32> to vector<16x32xf32>
    %198 = arith.mulf %196, %197 : vector<16x32xf32>
    %199 = vector.broadcast %178 : vector<1x32xf32> to vector<16x32xf32>
    %200 = arith.addf %198, %199 : vector<16x32xf32>
    %c0_94 = arith.constant 0 : index
    %c0_95 = arith.constant 0 : index
    %201 = vector.load %arg3[%c0_94, %c0_95] : memref<16x32xf32, #tpu.memory_space<vmem>>, vector<16x32xf32>
    tpu.vector_store %arg3[%c0_94, %c0_95], %200 {strides = array<i32>} : memref<16x32xf32, #tpu.memory_space<vmem>>, vector<16x32xf32>,
    return
  }
}

</mosaic_0001>

<bundles_post_ra>
// kernel: tpu_custom_call.1
= control target key start
LH: loop header
LB: loop body
LE: loop exit
PB: predicated region body
PF: predicated region fallthrough
CT: control target
= control target key end

     0   :  { %vm46_vm0 = vcmask 261120   ;;  %s3247_s0 = inlined_call_operand.vmem [shape: f32[16,32], index: 0, kind: input, shape index: {}]   ;;  %s3248_s1 = inlined_call_operand.vmem [shape: f32[128,32], index: 1, kind: input, shape index: {}]   ;;  %s3249_s2 = inlined_call_operand.vmem [shape: f32[88,128], index: 2, kind: input, shape index: {}]   ;;  %s3250_s3 = inlined_call_operand.hbm [shape: f32[16,32], index: 3, kind: output, shape index: {}]  }
   0x1   :  { %v36_v0 = vld [vmem:[%s3248_s1 + $0x8] sm:$0xff]  ;;  %v2942_v1 = vld [vmem:[%s3247_s0] sm:$0xff] }
   0x2   :  { %2627 = vmatprep.subr.msk.mxu1 %vm46_vm0, %v36_v0  ;;  %2629 = vmatprep.mubr.msk.f32.mxu1 %vm46_vm0, %v2942_v1  ;;  %v35_v2 = vld [vmem:[%s3248_s1] sm:$0xff] }
   0x3   :  { %8 = vsyncpa [#allocation3], 0  ;;  %2628 = vmatpush3.xpose.msk.msra.mxu1 %vm46_vm0, %v36_v0  ;;  %v2954_v3 = vld [vmem:[%s3247_s0 + $0x8] sm:$0xff]  ;;  %2622 = vmatprep.subr.msk.mxu0 %vm46_vm0, %v35_v2  ;;  %vm295_vm1 = vcmask 64512   ;;  %v2442_v6 = vld [vmem:[%s3249_s2 + $0x47] ss:$0 sm:$0xff]  ;;  %v17_v17 = vlaneseq }
   0x4   :  { %2623 = vmatpush3.xpose.msk.msra.mxu0 %vm46_vm0, %v35_v2  ;;  %2624 = vmatprep.mubr.msk.f32.mxu0 %vm46_vm0, %v2942_v1  ;;  %v2446_v4 = vld [vmem:[%s3249_s2 + $0x4b] ss:$0 sm:$0xff]  ;;  %vm2974_vm2 = vmpackc.low %vm295_vm1, %vm295_vm1  ;;  %v37_v16 = vld [vmem:[%s3248_s1 + $0x10] sm:$0xff]  ;;  %v2912_v25 = vmov -1e+09   ;;  %vm387_vm5 = vcmask 130048  }
   0x5   :  { %2632 = vmatprep.subr.msk.mxu0 %vm46_vm0, %v37_v16  ;;  %v18_v18 = vshrl.u32 %v17_v17, 7  ;;  %v21_v19 = vand.u32 127, %v17_v17  ;;  %v2450_v45 = vld [vmem:[%s3249_s2 + $0x4f] ss:$0 sm:$0xff]  ;;  %v38_v50 = vld [vmem:[%s3248_s1 + $0x60] sm:$0xff]  ;;  %v574_v58 = vld [vmem:[%s3248_s1 + $0x18] sm:$0xff] }
   0x6   :  { %2630 = vmatmul.mubr.msk.f32.vlgmr.msra.gmra.mrb[0].mxu1 %vm46_vm0, %v2954_v3  ;;  %v575_v57 = vld [vmem:[%s3248_s1 + $0x20] sm:$0xff]  ;;  %v576_v61 = vld [vmem:[%s3248_s1 + $0x28] sm:$0xff]  ;;  %s2913_s16 = smov [#allocation2]  }
   0x7   :  { %2625 = vmatmul.mubr.msk.f32.vlgmr.msra.gmra.mrb[0].mxu0 %vm46_vm0, %v2954_v3  ;;  %v19_v20 = vadd.s32 8, %v18_v18  ;;  %v22_v21 = vxor.u32 %v21_v19, %v18_v18  ;;  %v2462_v63 = vld [vmem:[%s3249_s2 + $0x48] ss:$0 sm:$0xff]  ;;  %s2430_s17 = sshll.u32 %s2913_s16, 4  ;;  %s2431_s17 = int_to_ptr.vmem [resolvable:$true] %s2430_s17 }
   0x8   :  { %2634 = vmatprep.mubr.msk.f32.mxu0 %vm46_vm0, %v2942_v1  ;;  %2633 = vmatpush3.xpose.msk.msra.mxu0 %vm46_vm0, %v37_v16  ;;  %s2888_s18 = scalar_lea.vmem %s2431_s17, 256  ;;  %p2893_p1 = scmp.lt.s32.totalorder %s2431_s17, %s2431_s17 }
   0x9   :  { %v23_v22 = vxor.u32 %v21_v19, %v19_v20  ;;  %vm24_vm3 = vcmp.lt.s32.totalorder %v22_v21, 8  ;;  %p2889_p0 = scmp.ne.s32.totalorder %s2431_s17, %s2888_s18  ;;  %p2894_p2 = scmp.lt.s32.totalorder %s2888_s18, %s2888_s18 }
   0xa   :  { %v2993_v26 = vsel %vm24_vm3, 0.0, %v2912_v25 }
   0xb   :  { %2635 = vmatmul.mubr.msk.f32.vlgmr.msra.gmra.mrb[2].mxu0 %vm46_vm0, %v2954_v3  ;;  %vm25_vm4 = vcmp.lt.s32.totalorder %v23_v22, 8  ;;  %p2895_p3 = por %p2894_p2, %p2893_p1 }
   0xc   :  { %v2995_v29 = vsel %vm25_vm4, 0.0, %v2912_v25 }
   0xd   :  { %p2896_p4 = pnand %p2895_p3, %p2889_p0 }
  0xd9   :  { %v2631_v5 = vpop.f32.mrb[0].mxu1 }
  0xda   :  { %v210_v7 = vadd.f32 %v2631_v5, %v2446_v4  ;;  %v204_v8 = vpop.f32.mrb[1].mxu1  ;;  %v2626_v9 = vpop.f32.mrb[0].mxu0  ;;  %v2466_v5 = vld [vmem:[%s3249_s2 + $0x4c] ss:$0 sm:$0xff] }
  0xdb   :  { %v205_v10 = vadd.f32 %v2446_v4, %v204_v8  ;;  %v122_v11 = vpop.f32.mrb[1].mxu0  ;;  %v128_v15 = vadd.f32 %v2626_v9, %v2442_v6 }
  0xdc   :  { %v123_v13 = vadd.f32 %v2442_v6, %v122_v11  ;;  %v2470_v11 = vld [vmem:[%s3249_s2 + $0x50] ss:$0 sm:$0xff] }
  0xdd   :  { %v2780_v14 = vpack.c.bf16 %v210_v7, %v205_v10 }
  0xde   :  { %2641 = vmatprep.mubr.msk.f32.mxu1 %vm295_vm1, %v123_v13  ;;  %v2636_v44 = vpop.f32.mrb[2].mxu0 }
  0xdf   :  { %2782 = vmatprep.subr.msk.bf16.mxu1 %vm2974_vm2, %v2780_v14  ;;  %v286_v46 = vpop.f32.mrb[3].mxu0  ;;  %v292_v47 = vadd.f32 %v2636_v44, %v2450_v45 }
  0xe0   :  { %2785 = vmatpush3.bf16.xpose.msk.msra.mxu1 %vm2974_vm2, %v2780_v14  ;;  %v287_v48 = vadd.f32 %v2450_v45, %v286_v46  ;;  %v1105_v45 = vld [vmem:[%s3248_s1 + $0x38] sm:$0xff]  ;;  %v577_v46 = vld [vmem:[%s3248_s1 + $0x68] sm:$0xff] }
  0xe1   :  { %2656 = vmatprep.subr.msk.mxu1 %vm46_vm0, %v574_v58 }
  0xe2   :  { %v2786_v49 = vpack.c.bf16 %v292_v47, %v287_v48 }
  0xe4   :  { %2787 = vmatprep.subr.bf16.mxu0 %v2786_v49 }
  0xe5   :  { %2789 = vmatpush3.bf16.msra.mxu0 %v2786_v49  ;;  %v2482_v49 = vld [vmem:[%s3249_s2 + $0x49] ss:$0 sm:$0xff] }
  0xe6   :  { %2651 = vmatprep.subr.mxu0 %v38_v50 }
  0xe7   :  { %2642 = vmatmul.mubr.msk.f32.vlgmr.msra.gmra.mrb[2].mxu1 %vm295_vm1, %v128_v15 }
  0xe8   :  { %2658 = vmatprep.mubr.msk.f32.mxu1 %vm46_vm0, %v2942_v1  ;;  %2657 = vmatpush3.xpose.msk.msra.mxu1 %vm46_vm0, %v574_v58 }
  0xe9   :  { %2666 = vmatprep.subr.msk.mxu1 %vm46_vm0, %v576_v61 }
  0xeb   :  { %2659 = vmatmul.mubr.msk.f32.vlgmr.msra.gmra.mrb[4].mxu1 %vm46_vm0, %v2954_v3 }
  0xec   :  { %2668 = vmatprep.mubr.msk.f32.mxu1 %vm46_vm0, %v2942_v1  ;;  %2667 = vmatpush3.xpose.msk.msra.mxu1 %vm46_vm0, %v576_v61 }
  0xef   :  { %2669 = vmatmul.mubr.msk.f32.vlgmr.msra.gmra.mrb[6].mxu1 %vm46_vm0, %v2954_v3 }
 0x1ba   :  { %v2643_v23 = vpop.f32.mrb[2].mxu1 }
 0x1bb   :  { %v374_v24 = vpop.f32.mrb[3].mxu1  ;;  %v384_v27 = vmul.f32 0.35355338, %v2643_v23 }
 0x1bc   :  { %v383_v28 = vmul.f32 0.35355338, %v374_v24 }
 0x1bd   :  { %v386_v32 = vadd.f32 %v384_v27, %v2995_v29 }
 0x1be   :  { %v385_v30 = vadd.f32 %v383_v28, %v2993_v26  ;;  %v2660_v62 = vpop.f32.mrb[4].mxu1 }
 0x1bf   :  { %v391_v33 = vsel %vm387_vm5, %v386_v32, -inf  ;;  %v660_v0 = vadd.f32 %v2660_v62, %v2462_v63  ;;  %v654_v2 = vpop.f32.mrb[5].mxu1 }
 0x1c0   :  { %v388_v31 = vsel %vm387_vm5, %v385_v30, -inf  ;;  %v655_v4 = vadd.f32 %v2462_v63, %v654_v2 }
 0x1c1   :  { %389 = vmax.xlane.f32.xlu0 %v388_v31 }
 0x1c2   :  { %2675 = vmatprep.mubr.msk.f32.mxu1 %vm295_vm1, %v655_v4  ;;  %v2670_v13 = vpop.f32.mrb[6].mxu1 }
 0x1c3   :  { %v824_v14 = vadd.f32 %v2670_v13, %v2470_v11  ;;  %v818_v15 = vpop.f32.mrb[7].mxu1 }
 0x1c4   :  { %v819_v16 = vadd.f32 %v2470_v11, %v818_v15 }
 0x1c5   :  { %392 = vmax.xlane.f32.xlu0 %v391_v33 }
 0x1c6   :  { %v2796_v17 = vpack.c.bf16 %v824_v14, %v819_v16 }
 0x24e   :  { %v390_v34 = vpop.xlane.xlu0 %389 }
 0x24f   :  { %v394_v35 = vsub.f32 %v385_v30, %v390_v34 }
 0x251   :  { %v396_v36 = vmul.f32 1.442695, %v394_v35 }
 0x252   :  { %v393_v37 = vpop.xlane.xlu0 %392 }
 0x253   :  { %2848 = vpow2.f32 %v396_v36  ;;  %v395_v38 = vsub.f32 %v386_v32, %v393_v37 }
 0x255   :  { %v398_v39 = vmul.f32 1.442695, %v395_v38  ;;  %v1104_v38 = vld [vmem:[%s3248_s1 + $0x30] sm:$0xff] }
 0x257   :  { %2850 = vpow2.f32 %v398_v39 }
 0x25d   :  { %v2849_v40 = vpop.eup %2848 }
 0x25e   :  { %v400_v41 = vsel %vm387_vm5, %v2849_v40, 0.0 }
 0x25f   :  { %401 = vadd.xlane.f32.xlu1 %v400_v41 }
 0x261   :  { %v2851_v42 = vpop.eup %2850 }
 0x262   :  { %v403_v43 = vsel %vm387_vm5, %v2851_v42, 0.0 }
 0x263   :  { %404 = vadd.xlane.f32.xlu1 %v403_v43 }
 0x2ec   :  { %v402_v51 = vpop.xlane.xlu1 %401 }
 0x2ed   :  { %2852 = vrcp.f32 %v402_v51 }
 0x2f0   :  { %v405_v52 = vpop.xlane.xlu1 %404 }
 0x2f1   :  { %2854 = vrcp.f32 %v405_v52 }
 0x2f7   :  { %v2853_v53 = vpop.eup %2852 }
 0x2f8   :  { %v407_v54 = vmul.f32 %v2853_v53, %v2849_v40  ;;  %v2486_v53 = vld [vmem:[%s3249_s2 + $0x4d] ss:$0 sm:$0xff] }
 0x2fa   :  { %2648 = vmatprep.mubr.msk.f32.mxu0 %vm387_vm5, %v407_v54 }
 0x2fb   :  { %v2855_v55 = vpop.eup %2854 }
 0x2fc   :  { %v409_v56 = vmul.f32 %v2855_v55, %v2851_v42 }
 0x2fe   :  { %2649 = vmatmul.mubr.msk.f32.vlgmr.msra.gmra.mrb[4].mxu0 %vm387_vm5, %v409_v56 }
 0x2ff   :  { %2652 = vmatpush3.msra.mxu0 %v38_v50 }
 0x300   :  { %2661 = vmatprep.subr.msk.mxu0 %vm46_vm0, %v575_v57 }
 0x3d1   :  { %v2650_v59 = vpop.f32.mrb[4].mxu0 }
 0x3d2   :  { %v482_v60 = vpop.f32.mrb[5].mxu0 }
 0x3d3   :  { %2653 = vmatprep.mubr.msk.f32.mxu0 %vm295_vm1, %v482_v60  ;;  %v1106_v60 = vld [vmem:[%s3248_s1 + $0x40] sm:$0xff] }
 0x3d4   :  { %2654 = vmatmul.mubr.msk.f32.vlgmr.msra.gmra.mrb[6].mxu0 %vm295_vm1, %v2650_v59 }
 0x3d5   :  { %2662 = vmatpush3.xpose.msk.msra.mxu0 %vm46_vm0, %v575_v57  ;;  %2663 = vmatprep.mubr.msk.f32.mxu0 %vm46_vm0, %v2942_v1 }
 0x3d6   :  { %2685 = vmatprep.subr.mxu0 %v577_v46 }
 0x3d8   :  { %2664 = vmatmul.mubr.msk.f32.vlgmr.msra.gmra.mrb[8].mxu0 %vm46_vm0, %v2954_v3 }
 0x3d9   :  { %2686 = vmatpush3.msra.mxu0 %v577_v46 }
 0x3da   :  { %2700 = vmatprep.subr.msk.mxu0 %vm46_vm0, %v1106_v60 }
 0x4ab   :  { %v2665_v6 = vpop.f32.mrb[8].mxu0 }
 0x4ac   :  { %v742_v7 = vadd.f32 %v2665_v6, %v2466_v5  ;;  %v736_v8 = vpop.f32.mrb[9].mxu0 }
 0x4ad   :  { %v737_v9 = vadd.f32 %v2466_v5, %v736_v8 }
 0x4af   :  { %v2790_v10 = vpack.c.bf16 %v742_v7, %v737_v9 }
 0x4b1   :  { %2792 = vmatprep.subr.msk.bf16.mxu1 %vm2974_vm2, %v2790_v10 }
 0x4b2   :  { %2795 = vmatpush3.bf16.xpose.msk.msra.mxu1 %vm2974_vm2, %v2790_v10 }
 0x4b3   :  { %2797 = vmatprep.subr.bf16.mxu1 %v2796_v17 }
 0x4b9   :  { %2676 = vmatmul.mubr.msk.f32.vlgmr.msra.gmra.mrb[8].mxu1 %vm295_vm1, %v660_v0 }
 0x4ba   :  { %2799 = vmatpush3.bf16.msra.mxu1 %v2796_v17 }
 0x4bb   :  { %2690 = vmatprep.subr.msk.mxu1 %vm46_vm0, %v1104_v38 }
 0x58c   :  { %v2677_v18 = vpop.f32.mrb[8].mxu1 }
 0x58d   :  { %v915_v19 = vmul.f32 0.35355338, %v2677_v18  ;;  %v905_v20 = vpop.f32.mrb[9].mxu1 }
 0x58e   :  { %v914_v21 = vmul.f32 0.35355338, %v905_v20 }
 0x58f   :  { %v917_v22 = vadd.f32 %v915_v19, %v2995_v29  ;;  %v2490_v19 = vld [vmem:[%s3249_s2 + $0x51] ss:$0 sm:$0xff] }
 0x590   :  { %v916_v23 = vadd.f32 %v914_v21, %v2993_v26 }
 0x591   :  { %v921_v24 = vsel %vm387_vm5, %v917_v22, -inf }
 0x592   :  { %922 = vmax.xlane.f32.xlu1 %v921_v24  ;;  %v918_v25 = vsel %vm387_vm5, %v916_v23, -inf  ;;  %v1107_v24 = vld [vmem:[%s3248_s1 + $0x70] sm:$0xff] }
 0x593   :  { %919 = vmax.xlane.f32.xlu0 %v918_v25 }
 0x61f   :  { %v923_v27 = vpop.xlane.xlu1 %922 }
 0x620   :  { %v925_v28 = vsub.f32 %v917_v22, %v923_v27  ;;  %v920_v30 = vpop.xlane.xlu0 %919 }
 0x621   :  { %v924_v31 = vsub.f32 %v916_v23, %v920_v30 }
 0x622   :  { %v928_v32 = vmul.f32 1.442695, %v925_v28 }
 0x623   :  { %v926_v33 = vmul.f32 1.442695, %v924_v31 }
 0x624   :  { %2856 = vpow2.f32 %v928_v32 }
 0x625   :  { %2858 = vpow2.f32 %v926_v33  ;;  %v1635_v33 = vld [vmem:[%s3248_s1 + $0x50] sm:$0xff] }
 0x62e   :  { %v2857_v34 = vpop.eup %2856 }
 0x62f   :  { %v2859_v35 = vpop.eup %2858  ;;  %v933_v36 = vsel %vm387_vm5, %v2857_v34, 0.0 }
 0x630   :  { %934 = vadd.xlane.f32.xlu1 %v933_v36  ;;  %v930_v37 = vsel %vm387_vm5, %v2859_v35, 0.0 }
 0x631   :  { %931 = vadd.xlane.f32.xlu0 %v930_v37 }
 0x6bd   :  { %v935_v39 = vpop.xlane.xlu1 %934 }
 0x6be   :  { %2860 = vrcp.f32 %v935_v39  ;;  %v932_v40 = vpop.xlane.xlu0 %931 }
 0x6bf   :  { %2862 = vrcp.f32 %v932_v40 }
 0x6c8   :  { %v2861_v41 = vpop.eup %2860 }
 0x6c9   :  { %v2863_v42 = vpop.eup %2862  ;;  %v939_v44 = vmul.f32 %v2861_v41, %v2857_v34  ;;  %v1634_v34 = vld [vmem:[%s3248_s1 + $0x48] sm:$0xff] }
 0x6ca   :  { %v937_v43 = vmul.f32 %v2863_v42, %v2859_v35  ;;  %v2506_v42 = vld [vmem:[%s3249_s2 + $0x4e] ss:$0 sm:$0xff] }
 0x6cc   :  { %2682 = vmatprep.mubr.msk.f32.mxu1 %vm387_vm5, %v937_v43 }
 0x6cd   :  { %2683 = vmatmul.mubr.msk.f32.vlgmr.msra.gmra.mrb[10].mxu1 %vm387_vm5, %v939_v44 }
 0x6ce   :  { %2691 = vmatpush3.xpose.msk.msra.mxu1 %vm46_vm0, %v1104_v38  ;;  %2692 = vmatprep.mubr.msk.f32.mxu1 %vm46_vm0, %v2942_v1  ;;  %v2502_v38 = vld [vmem:[%s3249_s2 + $0x4a] ss:$0 sm:$0xff] }
 0x6cf   :  { %2695 = vmatprep.subr.msk.mxu1 %vm46_vm0, %v1105_v45 }
 0x6d1   :  { %2693 = vmatmul.mubr.msk.f32.vlgmr.msra.gmra.mrb[12].mxu1 %vm46_vm0, %v2954_v3 }
 0x6d2   :  { %2696 = vmatpush3.xpose.msk.msra.mxu1 %vm46_vm0, %v1105_v45  ;;  %2697 = vmatprep.mubr.msk.f32.mxu1 %vm46_vm0, %v2942_v1 }
 0x6d5   :  { %2698 = vmatmul.mubr.msk.f32.vlgmr.msra.gmra.mrb[14].mxu1 %vm46_vm0, %v2954_v3 }
 0x7a0   :  { %v2684_v47 = vpop.f32.mrb[10].mxu1 }
 0x7a1   :  { %v1012_v48 = vpop.f32.mrb[11].mxu1 }
 0x7a2   :  { %2687 = vmatprep.mubr.msk.f32.mxu0 %vm295_vm1, %v1012_v48  ;;  %v1636_v48 = vld [vmem:[%s3248_s1 + $0x58] sm:$0xff] }
 0x7a3   :  { %2688 = vmatmul.mubr.msk.f32.vlgmr.msra.gmra.mrb[6].mxu0 %vm295_vm1, %v2684_v47 }
 0x7a4   :  { %v2694_v50 = vpop.f32.mrb[12].mxu1  ;;  %2702 = vmatprep.mubr.msk.f32.mxu0 %vm46_vm0, %v2942_v1  ;;  %2701 = vmatpush3.xpose.msk.msra.mxu0 %vm46_vm0, %v1106_v60 }
 0x7a5   :  { %v1184_v51 = vpop.f32.mrb[13].mxu1  ;;  %v1190_v59 = vadd.f32 %v2694_v50, %v2482_v49 }
 0x7a6   :  { %v1185_v52 = vadd.f32 %v2482_v49, %v1184_v51 }
 0x7a7   :  { %2703 = vmatmul.mubr.msk.f32.vlgmr.msra.gmra.mrb[10].mxu0 %vm46_vm0, %v2954_v3 }
 0x7a8   :  { %v2699_v54 = vpop.f32.mrb[14].mxu1  ;;  %2709 = vmatprep.mubr.msk.f32.mxu1 %vm295_vm1, %v1185_v52 }
 0x7a9   :  { %v1272_v55 = vadd.f32 %v2699_v54, %v2486_v53  ;;  %v1266_v56 = vpop.f32.mrb[15].mxu1 }
 0x7aa   :  { %v1267_v57 = vadd.f32 %v2486_v53, %v1266_v56 }
 0x7ac   :  { %v2800_v58 = vpack.c.bf16 %v1272_v55, %v1267_v57 }
 0x7ae   :  { %2802 = vmatprep.subr.msk.bf16.mxu1 %vm2974_vm2, %v2800_v58 }
 0x7af   :  { %2805 = vmatpush3.bf16.xpose.msk.msra.mxu1 %vm2974_vm2, %v2800_v58 }
 0x7b0   :  { %2724 = vmatprep.subr.msk.mxu1 %vm46_vm0, %v1634_v34 }
 0x7b6   :  { %2710 = vmatmul.mubr.msk.f32.vlgmr.msra.gmra.mrb[16].mxu1 %vm295_vm1, %v1190_v59 }
 0x7b7   :  { %2726 = vmatprep.mubr.msk.f32.mxu1 %vm46_vm0, %v2942_v1  ;;  %2725 = vmatpush3.xpose.msk.msra.mxu1 %vm46_vm0, %v1634_v34 }
 0x7b8   :  { %2734 = vmatprep.subr.msk.mxu1 %vm46_vm0, %v1636_v48 }
 0x7ba   :  { %2727 = vmatmul.mubr.msk.f32.vlgmr.msra.gmra.mrb[18].mxu1 %vm46_vm0, %v2954_v3 }
 0x7bb   :  { %2736 = vmatprep.mubr.msk.f32.mxu1 %vm46_vm0, %v2942_v1  ;;  %2735 = vmatpush3.xpose.msk.msra.mxu1 %vm46_vm0, %v1636_v48 }
 0x7be   :  { %2737 = vmatmul.mubr.msk.f32.vlgmr.msra.gmra.mrb[20].mxu1 %vm46_vm0, %v2954_v3 }
 0x87a   :  { %v2704_v18 = vpop.f32.mrb[10].mxu0 }
 0x87b   :  { %v1348_v20 = vpop.f32.mrb[11].mxu0  ;;  %v1354_v21 = vadd.f32 %v2704_v18, %v2490_v19  ;;  %v2441_v18 = vld [vmem:[%s3249_s2 + $0x41] ss:$0 sm:$0xff] }
 0x87c   :  { %v1349_v22 = vadd.f32 %v2490_v19, %v1348_v20  ;;  %v34_v19 = vadd.f32 %v2441_v18, %v2954_v3  ;;  %v33_v20 = vadd.f32 %v2441_v18, %v2942_v1 }
 0x87e   :  { %v2806_v23 = vpack.c.bf16 %v1354_v21, %v1349_v22 }
 0x880   :  { %2807 = vmatprep.subr.bf16.mxu0 %v2806_v23 }
 0x881   :  { %2809 = vmatpush3.bf16.msra.mxu0 %v2806_v23 }
 0x882   :  { %2719 = vmatprep.subr.mxu0 %v1107_v24 }
 0x889   :  { %v2711_v61 = vpop.f32.mrb[16].mxu1 }
 0x88a   :  { %v1445_v62 = vmul.f32 0.35355338, %v2711_v61  ;;  %v1435_v63 = vpop.f32.mrb[17].mxu1 }
 0x88b   :  { %v1444_v0 = vmul.f32 0.35355338, %v1435_v63 }
 0x88c   :  { %v1447_v2 = vadd.f32 %v1445_v62, %v2995_v29 }
 0x88d   :  { %v1446_v4 = vadd.f32 %v1444_v0, %v2993_v26  ;;  %v2728_v37 = vpop.f32.mrb[18].mxu1 }
 0x88e   :  { %v1451_v5 = vsel %vm387_vm5, %v1447_v2, -inf  ;;  %v1720_v39 = vadd.f32 %v2728_v37, %v2502_v38  ;;  %v1714_v40 = vpop.f32.mrb[19].mxu1  ;;  %v2205_v37 = vld [vmem:[%s3249_s2] sm:$0xff] }
 0x88f   :  { %1452 = vmax.xlane.f32.xlu1 %v1451_v5  ;;  %v1448_v6 = vsel %vm387_vm5, %v1446_v4, -inf  ;;  %v1715_v41 = vadd.f32 %v2502_v38, %v1714_v40  ;;  %v2206_v38 = vld [vmem:[%s3249_s2 + $0x8] sm:$0xff]  ;;  %v2207_v40 = vld [vmem:[%s3249_s2 + $0x10] sm:$0xff] }
 0x890   :  { %1449 = vmax.xlane.f32.xlu0 %v1448_v6 }
 0x891   :  { %v2738_v0 = vpop.f32.mrb[20].mxu1 }
 0x91c   :  { %v1453_v7 = vpop.xlane.xlu1 %1452 }
 0x91d   :  { %v1455_v8 = vsub.f32 %v1447_v2, %v1453_v7  ;;  %v1450_v9 = vpop.xlane.xlu0 %1449  ;;  %v2510_v2 = vld [vmem:[%s3249_s2 + $0x52] ss:$0 sm:$0xff] }
 0x91e   :  { %v1454_v10 = vsub.f32 %v1446_v4, %v1450_v9  ;;  %v1878_v4 = vpop.f32.mrb[21].mxu1  ;;  %v1884_v5 = vadd.f32 %v2738_v0, %v2510_v2 }
 0x91f   :  { %v1458_v11 = vmul.f32 1.442695, %v1455_v8  ;;  %v1879_v6 = vadd.f32 %v2510_v2, %v1878_v4  ;;  %v1637_v8 = vld [vmem:[%s3248_s1 + $0x78] sm:$0xff] }
 0x920   :  { %v1456_v13 = vmul.f32 1.442695, %v1454_v10 }
 0x921   :  { %2864 = vpow2.f32 %v1458_v11  ;;  %v2816_v7 = vpack.c.bf16 %v1884_v5, %v1879_v6 }
 0x922   :  { %2866 = vpow2.f32 %v1456_v13 }
 0x923   :  { %2817 = vmatprep.subr.bf16.mxu1 %v2816_v7 }
 0x924   :  { %2819 = vmatpush3.bf16.msra.mxu1 %v2816_v7  ;;  %v2527_v7 = vld [vmem:[%s3249_s2 + $0x46] ss:$0 sm:$0xff] }
 0x92b   :  { %v2865_v14 = vpop.eup %2864 }
 0x92c   :  { %v2867_v15 = vpop.eup %2866  ;;  %v1463_v16 = vsel %vm387_vm5, %v2865_v14, 0.0 }
 0x92d   :  { %1464 = vadd.xlane.f32.xlu1 %v1463_v16  ;;  %v1460_v17 = vsel %vm387_vm5, %v2867_v15, 0.0 }
 0x92e   :  { %1461 = vadd.xlane.f32.xlu0 %v1460_v17 }
 0x9ba   :  { %v1465_v25 = vpop.xlane.xlu1 %1464 }
 0x9bb   :  { %2868 = vrcp.f32 %v1465_v25  ;;  %v1462_v27 = vpop.xlane.xlu0 %1461 }
 0x9bc   :  { %2870 = vrcp.f32 %v1462_v27 }
 0x9c5   :  { %v2869_v28 = vpop.eup %2868 }
 0x9c6   :  { %v2871_v30 = vpop.eup %2870  ;;  %v1469_v32 = vmul.f32 %v2869_v28, %v2865_v14 }
 0x9c7   :  { %v1467_v31 = vmul.f32 %v2871_v30, %v2867_v15 }
 0x9c9   :  { %2716 = vmatprep.mubr.msk.f32.mxu0 %vm387_vm5, %v1467_v31 }
 0x9ca   :  { %2717 = vmatmul.mubr.msk.f32.vlgmr.msra.gmra.mrb[12].mxu0 %vm387_vm5, %v1469_v32 }
 0x9cb   :  { %2720 = vmatpush3.msra.mxu0 %v1107_v24 }
 0x9cc   :  { %2729 = vmatprep.subr.msk.mxu0 %vm46_vm0, %v1635_v33 }
 0xa9d   :  { %v2718_v35 = vpop.f32.mrb[12].mxu0 }
 0xa9e   :  { %v1542_v36 = vpop.f32.mrb[13].mxu0 }
 0xa9f   :  { %2721 = vmatprep.mubr.msk.f32.mxu0 %vm295_vm1, %v1542_v36 }
 0xaa0   :  { %2722 = vmatmul.mubr.msk.f32.vlgmr.msra.gmra.mrb[6].mxu0 %vm295_vm1, %v2718_v35 }
 0xaa1   :  { %2730 = vmatpush3.xpose.msk.msra.mxu0 %vm46_vm0, %v1635_v33  ;;  %2731 = vmatprep.mubr.msk.f32.mxu0 %vm46_vm0, %v2942_v1 }
 0xaa4   :  { %2732 = vmatmul.mubr.msk.f32.vlgmr.msra.gmra.mrb[14].mxu0 %vm46_vm0, %v2954_v3 }
 0xaa5   :  { %2743 = vmatprep.mubr.msk.f32.mxu0 %vm295_vm1, %v1715_v41  ;;  %v2208_v41 = vld [vmem:[%s3249_s2 + $0x18] sm:$0xff] }
 0xb77   :  { %v2733_v43 = vpop.f32.mrb[14].mxu0 }
 0xb78   :  { %v1802_v44 = vadd.f32 %v2733_v43, %v2506_v42  ;;  %v1796_v45 = vpop.f32.mrb[15].mxu0  ;;  %v2297_v43 = vld [vmem:[%s3249_s2 + $0x20] sm:$0xff] }
 0xb79   :  { %v1797_v46 = vadd.f32 %v2506_v42, %v1796_v45  ;;  %v2824_v42 = vpack.c.bf16 %v2208_v41, %v2207_v40  ;;  %v2299_v45 = vld [vmem:[%s3249_s2 + $0x30] sm:$0xff] }
 0xb7b   :  { %v2810_v47 = vpack.c.bf16 %v1802_v44, %v1797_v46  ;;  %v2298_v44 = vld [vmem:[%s3249_s2 + $0x28] sm:$0xff] }
 0xb7c   :  { %v2828_v46 = vpack.c.bf16 %v2298_v44, %v2297_v43 }
 0xb7d   :  { %2812 = vmatprep.subr.msk.bf16.mxu0 %vm2974_vm2, %v2810_v47 }
 0xb7e   :  { %2815 = vmatpush3.bf16.xpose.msk.msra.mxu0 %vm2974_vm2, %v2810_v47  ;;  %v2300_v47 = vld [vmem:[%s3249_s2 + $0x38] sm:$0xff] }
 0xb7f   :  { %2753 = vmatprep.subr.mxu0 %v1637_v8  ;;  %v2832_v48 = vpack.c.bf16 %v2300_v47, %v2299_v45 }
 0xb85   :  { %2744 = vmatmul.mubr.msk.f32.vlgmr.msra.gmra.mrb[16].mxu0 %vm295_vm1, %v1720_v39  ;;  %v2820_v39 = vpack.c.bf16 %v2206_v38, %v2205_v37  ;;  %v2529_v38 = vld [vmem:[%s3249_s2 + $0x45] ss:$0 sm:$0xff] }
 0xb86   :  { %2754 = vmatpush3.msra.mxu0 %v1637_v8 }
 0xb87   :  { %2821 = vmatprep.subr.bf16.mxu1 %v2820_v39  ;;  %2829 = vmatprep.subr.bf16.mxu0 %v2828_v46 }
 0xc58   :  { %v2745_v49 = vpop.f32.mrb[16].mxu0 }
 0xc59   :  { %v1975_v50 = vmul.f32 0.35355338, %v2745_v49  ;;  %v1965_v51 = vpop.f32.mrb[17].mxu0 }
 0xc5a   :  { %v1974_v52 = vmul.f32 0.35355338, %v1965_v51 }
 0xc5b   :  { %v1977_v12 = vadd.f32 %v1975_v50, %v2995_v29 }
 0xc5c   :  { %v1976_v53 = vadd.f32 %v1974_v52, %v2993_v26 }
 0xc5d   :  { %v1981_v54 = vsel %vm387_vm5, %v1977_v12, -inf }
 0xc5e   :  { %1982 = vmax.xlane.f32.xlu1 %v1981_v54  ;;  %v1978_v55 = vsel %vm387_vm5, %v1976_v53, -inf }
 0xc5f   :  { %1979 = vmax.xlane.f32.xlu0 %v1978_v55  ;;  %v2522_v55 = vld [vmem:[%s3249_s2 + $0x42] ss:$0 sm:$0xff] }
 0xceb   :  { %v1983_v56 = vpop.xlane.xlu1 %1982 }
 0xcec   :  { %v1985_v57 = vsub.f32 %v1977_v12, %v1983_v56  ;;  %v1980_v58 = vpop.xlane.xlu0 %1979 }
 0xced   :  { %v1984_v59 = vsub.f32 %v1976_v53, %v1980_v58 }
 0xcee   :  { %v1988_v60 = vmul.f32 1.442695, %v1985_v57 }
 0xcef   :  { %v1986_v61 = vmul.f32 1.442695, %v1984_v59  ;;  %v2523_v59 = vld [vmem:[%s3249_s2 + $0x43] ss:$0 sm:$0xff] }
 0xcf0   :  { %2872 = vpow2.f32 %v1988_v60 }
 0xcf1   :  { %2874 = vpow2.f32 %v1986_v61 }
 0xcfa   :  { %v2873_v62 = vpop.eup %2872 }
 0xcfb   :  { %v2875_v63 = vpop.eup %2874  ;;  %v1993_v29 = vsel %vm387_vm5, %v2873_v62, 0.0 }
 0xcfc   :  { %1994 = vadd.xlane.f32.xlu1 %v1993_v29  ;;  %v1990_v26 = vsel %vm387_vm5, %v2875_v63, 0.0  ;;  %v2524_v29 = vld [vmem:[%s3249_s2 + $0x40] ss:$0 sm:$0xff] }
 0xcfd   :  { %1991 = vadd.xlane.f32.xlu0 %v1990_v26 }
 0xd89   :  { %v1995_v9 = vpop.xlane.xlu1 %1994 }
 0xd8a   :  { %2876 = vrcp.f32 %v1995_v9  ;;  %v1992_v10 = vpop.xlane.xlu0 %1991 }
 0xd8b   :  { %2878 = vrcp.f32 %v1992_v10 }
 0xd94   :  { %v2877_v11 = vpop.eup %2876 }
 0xd95   :  { %v2879_v13 = vpop.eup %2878  ;;  %v1999_v15 = vmul.f32 %v2877_v11, %v2873_v62 }
 0xd96   :  { %v1997_v14 = vmul.f32 %v2879_v13, %v2875_v63 }
 0xd98   :  { %2750 = vmatprep.mubr.msk.f32.mxu1 %vm387_vm5, %v1997_v14 }
 0xd99   :  { %2751 = vmatmul.mubr.msk.f32.vlgmr.msra.gmra.mrb[22].mxu1 %vm387_vm5, %v1999_v15 }
 0xd9a   :  { %2823 = vmatpush3.bf16.msra.mxu1 %v2820_v39 }
 0xd9b   :  { %2825 = vmatprep.subr.bf16.mxu1 %v2824_v42 }
 0xd9e   :  { %2827 = vmatpush3.bf16.msra.mxu1 %v2824_v42 }
 0xe6c   :  { %v2752_v16 = vpop.f32.mrb[22].mxu1 }
 0xe6d   :  { %v2072_v17 = vpop.f32.mrb[23].mxu1 }
 0xe6e   :  { %2755 = vmatprep.mubr.msk.f32.mxu0 %vm295_vm1, %v2072_v17 }
 0xe6f   :  { %2756 = vmatmul.mubr.msk.f32.vlgmr.msra.gmra.mrb[6].mxu0 %vm295_vm1, %v2752_v16 }
 0xe70   :  { %2831 = vmatpush3.bf16.xpose.msra.mxu0 %v2828_v46 }
 0xe71   :  { %2833 = vmatprep.subr.bf16.mxu0 %v2832_v48 }
 0xe78   :  { %2835 = vmatpush3.bf16.xpose.msra.mxu0 %v2832_v48 }
 0xf42   :  { %v2757_v21 = vpop.f32.mrb[6].mxu0 }
 0xf43   :  { %v2836_v22 = vadd.f32 %v2757_v21, %v34_v19  ;;  %v2153_v23 = vpop.f32.mrb[7].mxu0 }
 0xf44   :  { %v2837_v24 = vadd.f32 %v2153_v23, %v33_v20 }
 0xf45   :  { %v2169_v25 = vsel %vm46_vm0, %v2836_v22, 0.0 }
 0xf46   :  { %2170 = vadd.xlane.f32.xlu1 %v2169_v25  ;;  %v2166_v27 = vsel %vm46_vm0, %v2837_v24, 0.0 }
 0xf47   :  { %2167 = vadd.xlane.f32.xlu0 %v2166_v27 }
 0xfd3   :  { %v2171_v28 = vpop.xlane.xlu1 %2170 }
 0xfd4   :  { %v2174_v30 = vmul.f32 0.03125, %v2171_v28  ;;  %v2168_v31 = vpop.xlane.xlu0 %2167 }
 0xfd5   :  { %v2173_v32 = vmul.f32 0.03125, %v2168_v31 }
 0xfd6   :  { %v2176_v33 = vsub.f32 %v2836_v22, %v2174_v30 }
 0xfd7   :  { %v2175_v34 = vsub.f32 %v2837_v24, %v2173_v32 }
 0xfd8   :  { %v2178_v35 = vmul.f32 %v2176_v33, %v2176_v33 }
 0xfd9   :  { %v2177_v3 = vmul.f32 %v2175_v34, %v2175_v34 }
 0xfda   :  { %v2182_v1 = vsel %vm46_vm0, %v2178_v35, 0.0 }
 0xfdb   :  { %2183 = vadd.xlane.f32.xlu1 %v2182_v1  ;;  %v2179_v36 = vsel %vm46_vm0, %v2177_v3, 0.0  ;;  %v2528_v3 = vld [vmem:[%s3249_s2 + $0x44] ss:$0 sm:$0xff] }
 0xfdc   :  { %2180 = vadd.xlane.f32.xlu0 %v2179_v36 }
0x1068   :  { %v2184_v49 = vpop.xlane.xlu1 %2183 }
0x1069   :  { %v2186_v50 = vmul.f32 0.03125, %v2184_v49  ;;  %v2181_v51 = vpop.xlane.xlu0 %2180 }
0x106a   :  { %v2185_v52 = vmul.f32 0.03125, %v2181_v51 }
0x106b   :  { %v2188_v12 = vadd.f32 1e-05, %v2186_v50 }
0x106c   :  { %v2187_v53 = vadd.f32 1e-05, %v2185_v52 }
0x106d   :  { %2880 = vrsqrt.f32 %v2188_v12 }
0x106e   :  { %2882 = vrsqrt.f32 %v2187_v53 }
0x1077   :  { %v2881_v54 = vpop.eup %2880 }
0x1078   :  { %v2883_v56 = vpop.eup %2882  ;;  %v2192_v57 = vmul.f32 %v2881_v54, %v2176_v33 }
0x1079   :  { %v2191_v58 = vmul.f32 %v2883_v56, %v2175_v34 }
0x107a   :  { %v2198_v60 = vmul.f32 %v2522_v55, %v2192_v57 }
0x107b   :  { %v2197_v61 = vmul.f32 %v2522_v55, %v2191_v58 }
0x107c   :  { %v2204_v63 = vadd.f32 %v2523_v59, %v2198_v60 }
0x107d   :  { %v2203_v62 = vadd.f32 %v2523_v59, %v2197_v61 }
0x107f   :  { %2766 = vmatprep.mubr.msk.f32.mxu1 %vm46_vm0, %v2203_v62 }
0x1080   :  { %2767 = vmatmul.mubr.msk.f32.vlgmr.msra.gmra.mrb[24].mxu1 %vm46_vm0, %v2204_v63 }
0x1153   :  { %v2768_v26 = vpop.f32.mrb[24].mxu1 }
0x1154   :  { %v2292_v0 = vadd.f32 %v2768_v26, %v2524_v29  ;;  %v2286_v2 = vpop.f32.mrb[25].mxu1 }
0x1155   :  { %v2287_v4 = vadd.f32 %v2524_v29, %v2286_v2 }
0x1156   :  { %v2296_v6 = vmax.f32 %v2292_v0, 0.0 }
0x1157   :  { %v2295_v5 = vmax.f32 %v2287_v4, 0.0 }
0x1159   :  { %2777 = vmatprep.mubr.f32.mxu0 %v2295_v5 }
0x115a   :  { %2778 = vmatmul.mubr.f32.vlgmr.msra.gmra.mrb[18].mxu0 %v2296_v6 }
0x122d   :  { %v2779_v8 = vpop.f32.mrb[18].mxu0 }
0x122e   :  { %v2378_v9 = vadd.f32 %v2779_v8, %v2527_v7  ;;  %v2372_v10 = vpop.f32.mrb[19].mxu0 }
0x122f   :  { %v2373_v11 = vadd.f32 %v2527_v7, %v2372_v10 }
0x1230   :  { %v2382_v13 = vadd.f32 %v2378_v9, %v2204_v63 }
0x1231   :  { %v2381_v14 = vadd.f32 %v2373_v11, %v2203_v62 }
0x1232   :  { %v2388_v15 = vsel %vm46_vm0, %v2382_v13, 0.0 }
0x1233   :  { %2389 = vadd.xlane.f32.xlu1 %v2388_v15  ;;  %v2385_v16 = vsel %vm46_vm0, %v2381_v14, 0.0 }
0x1234   :  { %2386 = vadd.xlane.f32.xlu0 %v2385_v16 }
0x12c0   :  { %v2390_v17 = vpop.xlane.xlu1 %2389 }
0x12c1   :  { %v2392_v18 = vmul.f32 0.03125, %v2390_v17  ;;  %v2387_v19 = vpop.xlane.xlu0 %2386 }
0x12c2   :  { %v2391_v20 = vmul.f32 0.03125, %v2387_v19 }
0x12c3   :  { %v2394_v21 = vsub.f32 %v2382_v13, %v2392_v18 }
0x12c4   :  { %v2393_v22 = vsub.f32 %v2381_v14, %v2391_v20 }
0x12c5   :  { %v2396_v23 = vmul.f32 %v2394_v21, %v2394_v21 }
0x12c6   :  { %v2395_v24 = vmul.f32 %v2393_v22, %v2393_v22 }
0x12c7   :  { %v2400_v25 = vsel %vm46_vm0, %v2396_v23, 0.0 }
0x12c8   :  { %2401 = vadd.xlane.f32.xlu1 %v2400_v25  ;;  %v2397_v27 = vsel %vm46_vm0, %v2395_v24, 0.0 }
0x12c9   :  { %2398 = vadd.xlane.f32.xlu0 %v2397_v27 }
0x1355   :  { %v2402_v28 = vpop.xlane.xlu1 %2401 }
0x1356   :  { %v2404_v30 = vmul.f32 0.03125, %v2402_v28  ;;  %v2399_v31 = vpop.xlane.xlu0 %2398 }
0x1357   :  { %v2403_v32 = vmul.f32 0.03125, %v2399_v31 }
0x1358   :  { %v2406_v33 = vadd.f32 1e-05, %v2404_v30 }
0x1359   :  { %v2405_v34 = vadd.f32 1e-05, %v2403_v32 }
0x135a   :  { %2884 = vrsqrt.f32 %v2406_v33 }
0x135b   :  { %2886 = vrsqrt.f32 %v2405_v34 }
0x1364   :  { %v2885_v35 = vpop.eup %2884 }
0x1365   :  { %v2887_v1 = vpop.eup %2886  ;;  %v2410_v36 = vmul.f32 %v2885_v35, %v2394_v21 }
0x1366   :  { %v2409_v37 = vmul.f32 %v2887_v1, %v2393_v22 }
0x1367   :  { %v2416_v39 = vmul.f32 %v2528_v3, %v2410_v36 }
0x1368   :  { %v2415_v40 = vmul.f32 %v2528_v3, %v2409_v37 }
0x1369   :  { %v2422_v41 = vadd.f32 %v2529_v38, %v2416_v39 }
0x136a   :  { %v2421_v42 = vadd.f32 %v2529_v38, %v2415_v40 }
0x136b   :  { %2424 = vst.msk [vmem:[#allocation2 + $0x8] sm:$0xff] %vm46_vm0, %v2422_v41 }
0x136c   :  { %2423 = vst.msk [vmem:[#allocation2] sm:$0xff] %vm46_vm0, %v2421_v42 }
0x136d   :  { %2899 = shalt.err (!%p2896_p4)
}
0x136e   :  { %s2900_s20 = scalar_lea.hbm %s3250_s3, 256 }
0x136f   :  { %p2901_p5 = scmp.ne.s32.totalorder %s3250_s3, %s2900_s20  ;;  %p2904_p6 = scmp.lt.u32.totalorder %s2900_s20, %s3250_s3 }
0x1371   :  { %p2906_p7 = pnand %p2904_p6, %p2901_p5 }
0x1373   :  { %2909 = shalt.err (!%p2906_p7)
}
0x1374   :  { %s2914_s24 = smov 128   ;;  %s2915_s25 = smov 8  }
0x1375   :  { %2436 = dma.vmem_to_hbm [thread:$0]  %s2431_s17, 256, %s3250_s3, [#allocation3], %s2914_s24, %s2914_s24, %s2915_s25  }
0x1376   :  { %2910 = dma.done.wait [#allocation3], 256  }
0x1377   :  { %2911 = vsyncadd [#allocation3], 4294967040 }
0x1378   :  { %2440 = vsyncpa [#allocation3], 1 }

</bundles_post_ra>
